<compile_context>
chip_gen: v7x
topology: tpu7x:2x2x1
jax: 0.10.0
libtpu: 0.0.40
codegen_flags: <defaults>
</compile_context>

<pallas_src>
import functools
import math

import jax
import jax.numpy as jnp
from jax import lax
from jax.experimental import pallas as pl
from jax.experimental.pallas import tpu as pltpu


LANE = 128                      # channel padding target (lane width)
SUB = 16                        # row granularity (bf16 sublane packing)
VMEM_BUDGET = 30 * 1024 * 1024  # per-layer working-set target (v7x-safe)


def _round_up(v, m):
    return (v + m - 1) // m * m


# ---------------------------------------------------------------------------
# Kernel body: stride-1 K-tap conv as one im2col matmul
# (optionally fused Resnet1D block: relu -> conv1 -> relu -> 1x1 -> +residual)
# ---------------------------------------------------------------------------
def _conv_kernel(xl_ref, xm_ref, xr_ref, w_ref, b_ref, *rest,
                 offs, tile, halo, cin, t_in, t_out,
                 in_mask, out_mask, relu_in, relu_out, fused):
    """Per grid step (bi, ti) — three windows of the SAME (B, rows, cin) array:
         xl_ref: (1, halo, cin)  rows [ti*tile - halo, ti*tile)   left halo
         xm_ref: (1, tile, cin)  rows [ti*tile, (ti+1)*tile)      main block
         xr_ref: (1, halo, cin)  rows [(ti+1)*tile, ... + halo)   right halo
       w_ref: (K*cin, cmid) packed im2col weights, b_ref: (1, cmid).
       Fused path adds w2_ref (cmid, cout), b2_ref (1, cout)."""
    if fused:
        w2_ref, b2_ref, out_ref, col_ref = rest
    else:
        out_ref, col_ref = rest

    ti = pl.program_id(1)

    xm = xm_ref[0]
    xr = xr_ref[0]
    # Left halo: the first tile's left window must read as zeros (the conv's
    # left zero-padding); otherwise it is the tail of the previous tile.
    xl = xl_ref[0] * (ti > 0).astype(xm.dtype)

    # Activation applied ONCE to the window (not per tap).
    xl_a = jnp.maximum(xl, 0) if relu_in else xl
    xm_a = jnp.maximum(xm, 0) if relu_in else xm
    xr_a = jnp.maximum(xr, 0) if relu_in else xr
    if in_mask:
        # Rows at/after the logical input length act as the right zero pad.
        rows_m = ti * tile + lax.broadcasted_iota(jnp.int32, (tile, 1), 0)
        rows_r = (ti + 1) * tile + lax.broadcasted_iota(jnp.int32, (halo, 1), 0)
        xm_a = jnp.where(rows_m < t_in, xm_a, jnp.zeros_like(xm_a))
        xr_a = jnp.where(rows_r < t_in, xr_a, jnp.zeros_like(xr_a))

    # im2col: tap k (row offset offs[k]) -> lane block [k*cin, (k+1)*cin).
    for k, off in enumerate(offs):
        c0, c1 = k * cin, (k + 1) * cin
        if off == 0:
            col_ref[:, c0:c1] = xm_a
        elif off < 0:
            o = -off
            col_ref[0:o, c0:c1] = xl_a[halo - o:halo, :]
            col_ref[o:tile, c0:c1] = xm_a[0:tile - o, :]
        else:
            col_ref[0:tile - off, c0:c1] = xm_a[off:tile, :]
            col_ref[tile - off:tile, c0:c1] = xr_a[0:off, :]

    # Single MXU matmul over the full K*cin contraction.
    acc = jnp.dot(col_ref[...], w_ref[...], preferred_element_type=jnp.float32)
    acc = acc + b_ref[...].astype(jnp.float32)

    if fused:
        w2 = w2_ref[...]
        h = jnp.maximum(acc, 0.0).astype(w2.dtype)
        y = jnp.dot(h, w2, preferred_element_type=jnp.float32)
        y = y + b2_ref[...].astype(jnp.float32) + xm.astype(jnp.float32)
    else:
        y = jnp.maximum(acc, 0.0) if relu_out else acc

    if out_mask:
        # Zero rows beyond T_out so the stored activation doubles as the next
        # layer's right zero padding (no host-side pad/slice between layers).
        rows = ti * tile + lax.broadcasted_iota(jnp.int32, (tile, 1), 0)
        y = jnp.where(rows < t_out, y, 0.0)
    out_ref[0] = y.astype(out_ref.dtype)


# ---------------------------------------------------------------------------
# Pallas conv wrapper: time-tiled grid, halos read from the same array
# ---------------------------------------------------------------------------
def conv_block(x, *, t_in, t_out, tile, n_tiles, halo, out_rows, in_written,
               offs, w, b, w2=None, b2=None, relu_in=False, relu_out=False,
               vmem_limit=32 * 1024 * 1024, out_dtype=jnp.bfloat16):
    """x: (B, S_in, Cin) channels-last bf16.  Rows [t_in, in_written) of x are
       guaranteed zero; rows >= in_written may be garbage (masked in-kernel
       when they could reach a valid output).  Returns (B, out_rows, Cout)
       with rows >= t_out zeroed inside the written extent n_tiles*tile."""
    B, S_in, Cin = x.shape
    K = len(offs)
    KC, Cmid = w.shape
    assert KC == K * Cin, (KC, K, Cin)
    fused = w2 is not None
    Cout = w2.shape[1] if fused else Cmid

    dmax = max(abs(o) for o in offs)
    assert tile % halo == 0 and tile >= halo
    assert dmax <= halo and dmax < tile
    assert S_in >= n_tiles * tile + halo, (S_in, n_tiles, tile, halo)
    assert out_rows >= n_tiles * tile
    R = tile // halo

    in_mask = in_written < t_out + max(offs)    # garbage could reach valid rows
    out_mask = t_out < n_tiles * tile           # tail rows must be zeroed

    kernel = functools.partial(
        _conv_kernel, offs=tuple(offs), tile=tile, halo=halo, cin=Cin,
        t_in=t_in, t_out=t_out, in_mask=in_mask, out_mask=out_mask,
        relu_in=relu_in, relu_out=relu_out, fused=fused)

    in_specs = [
        pl.BlockSpec((1, halo, Cin),
                     lambda bi, ti: (bi, jnp.maximum(ti * R - 1, 0), 0)),
        pl.BlockSpec((1, tile, Cin), lambda bi, ti: (bi, ti, 0)),
        pl.BlockSpec((1, halo, Cin), lambda bi, ti: (bi, (ti + 1) * R, 0)),
        pl.BlockSpec((K * Cin, Cmid), lambda bi, ti: (0, 0)),
        pl.BlockSpec((1, Cmid), lambda bi, ti: (0, 0)),
    ]
    inputs = [x, x, x, w, b]
    if fused:
        in_specs += [pl.BlockSpec((Cmid, Cout), lambda bi, ti: (0, 0)),
                     pl.BlockSpec((1, Cout), lambda bi, ti: (0, 0))]
        inputs += [w2, b2]

    return pl.pallas_call(
        kernel,
        out_shape=jax.ShapeDtypeStruct((B, out_rows, Cout), out_dtype),
        grid=(B, n_tiles),
        in_specs=in_specs,
        out_specs=pl.BlockSpec((1, tile, Cout), lambda bi, ti: (bi, ti, 0)),
        scratch_shapes=[pltpu.VMEM((tile, K * Cin), x.dtype)],
        compiler_params=pltpu.CompilerParams(
            dimension_semantics=("parallel", "parallel"),
            vmem_limit_bytes=int(vmem_limit)),
    )(*inputs)


# ---------------------------------------------------------------------------
# Parameter init (deterministic, PyTorch Conv1d default-style uniform init)
# ---------------------------------------------------------------------------
def _init_conv(key, cin, cout, k):
    kw, kb = jax.random.split(key)
    bound = 1.0 / math.sqrt(cin * k)
    w = jax.random.uniform(kw, (cout, cin, k), jnp.float32, -bound, bound)
    b = jax.random.uniform(kb, (cout,), jnp.float32, -bound, bound)
    return {"w": w, "b": b}


def init_encoder_params(key, input_emb_width, output_emb_width, down_t,
                        stride_t, width, depth, dilation_growth_rate):
    n_keys = 2 + down_t * (1 + 2 * depth)
    keys = iter(jax.random.split(key, n_keys))
    params = {"conv_in": _init_conv(next(keys), input_emb_width, width, 3)}
    filter_t = stride_t * 2
    downs = []
    for _ in range(down_t):
        d = {"down": _init_conv(next(keys), width, width, filter_t), "res": []}
        # Resnet1D(reverse_dilation=True): dilations rate**(depth-1), ..., 1
        for j in range(depth):
            dil = dilation_growth_rate ** (depth - 1 - j)
            d["res"].append({
                "dilation": dil,
                "conv1": _init_conv(next(keys), width, width, 3),
                "conv2": _init_conv(next(keys), width, width, 1),
            })
        downs.append(d)
    params["down"] = downs
    params["conv_out"] = _init_conv(next(keys), width, output_emb_width, 3)
    return params


# ---------------------------------------------------------------------------
# One-time conversion to kernel-ready layout (transpose, pad, pack, bf16)
# ---------------------------------------------------------------------------
def _pack_taps(w, b, cin_pad, cout_pad):
    """(cout, cin, K) PyTorch conv weight -> (K*cin_pad, cout_pad) im2col pack."""
    cout, cin, K = w.shape
    blocks = []
    for k in range(K):
        blk = jnp.zeros((cin_pad, cout_pad), jnp.float32)
        blk = blk.at[:cin, :cout].set(jnp.transpose(w[:, :, k]))
        blocks.append(blk)
    packed = jnp.concatenate(blocks, axis=0).astype(jnp.bfloat16)
    bp = jnp.pad(b, (0, cout_pad - cout)).reshape(1, cout_pad).astype(jnp.float32)
    return packed, bp


def _pack_group(w, b, s, cin_pad, cout_pad):
    """Strided (stride=s, kernel=2s, pad=s//2) conv folded into a 3-tap
       stride-1 conv over rows grouped s-at-a-time (channel dim = s*cin)."""
    cout, cin, K = w.shape
    assert K == 2 * s
    p = s // 2
    taps = []
    for g in (-1, 0, 1):
        blk = jnp.zeros((s * cin_pad, cout_pad), jnp.float32)
        for m in range(s):
            k = g * s + m + p
            if 0 <= k < K:
                blk = blk.at[m * cin_pad:m * cin_pad + cin, :cout].set(
                    jnp.transpose(w[:, :, k]))
        taps.append(blk)
    packed = jnp.concatenate(taps, axis=0).astype(jnp.bfloat16)
    bp = jnp.pad(b, (0, cout_pad - cout)).reshape(1, cout_pad).astype(jnp.float32)
    return packed, bp


def prepare_encoder_params(params, stride_t):
    ci = params["conv_in"]["w"].shape[1]
    width = params["conv_in"]["w"].shape[0]
    co = params["conv_out"]["w"].shape[0]
    cip = _round_up(ci, LANE)
    wp = _round_up(width, LANE)
    cop = _round_up(co, LANE)

    layers = []

    w_pk, b_pk = _pack_taps(params["conv_in"]["w"], params["conv_in"]["b"],
                            cip, wp)
    layers.append(dict(name="conv_in", group=1, offs=(-1, 0, 1),
                       kernel=3, stride=1, pad=1, dil=1,
                       w=w_pk, b=b_pk, w2=None, b2=None,
                       relu_in=False, relu_out=True,
                       cin_dom=cip, cmid=wp, cout=wp))

    s = stride_t
    for d in params["down"]:
        if s > 1:
            w_pk, b_pk = _pack_group(d["down"]["w"], d["down"]["b"], s, wp, wp)
            layers.append(dict(name="down", group=s, offs=(-1, 0, 1),
                               kernel=2 * s, stride=s, pad=s // 2, dil=1,
                               w=w_pk, b=b_pk, w2=None, b2=None,
                               relu_in=False, relu_out=False,
                               cin_dom=s * wp, cmid=wp, cout=wp))
        else:  # stride_t == 1: plain kernel-2, pad-0 conv
            w_pk, b_pk = _pack_taps(d["down"]["w"], d["down"]["b"], wp, wp)
            layers.append(dict(name="down", group=1, offs=(0, 1),
                               kernel=2, stride=1, pad=0, dil=1,
                               w=w_pk, b=b_pk, w2=None, b2=None,
                               relu_in=False, relu_out=False,
                               cin_dom=wp, cmid=wp, cout=wp))
        for blk in d["res"]:
            dil = int(blk["dilation"])
            w1, b1 = _pack_taps(blk["conv1"]["w"], blk["conv1"]["b"], wp, wp)
            w2 = blk["conv2"]["w"][:, :, 0]                  # (cout, cin)
            cout2, cin2 = w2.shape
            w2p = jnp.zeros((wp, wp), jnp.float32)
            w2p = w2p.at[:cin2, :cout2].set(jnp.transpose(w2))
            b2p = jnp.pad(blk["conv2"]["b"], (0, wp - cout2)).reshape(1, wp)
            layers.append(dict(name="res", group=1, offs=(-dil, 0, dil),
                               kernel=3, stride=1, pad=dil, dil=dil,
                               w=w1, b=b1,
                               w2=w2p.astype(jnp.bfloat16),
                               b2=b2p.astype(jnp.float32),
                               relu_in=True, relu_out=False,
                               cin_dom=wp, cmid=wp, cout=wp))

    w_pk, b_pk = _pack_taps(params["conv_out"]["w"], params["conv_out"]["b"],
                            wp, cop)
    layers.append(dict(name="conv_out", group=1, offs=(-1, 0, 1),
                       kernel=3, stride=1, pad=1, dil=1,
                       w=w_pk, b=b_pk, w2=None, b2=None,
                       relu_in=False, relu_out=False,
                       cin_dom=wp, cmid=cop, cout=cop))

    return dict(cin=ci, cout=co, cin_pad=cip, width_pad=wp, cout_pad=cop,
                layers=layers)


# ---------------------------------------------------------------------------
# Static planning: per-layer tile / grid / storage sizes and VMEM budget
# ---------------------------------------------------------------------------
def _vmem_estimate(tile, halo, layer):
    cin, cmid, cout = layer["cin_dom"], layer["cmid"], layer["cout"]
    k = len(layer["offs"])
    bf = 2
    est = 2 * tile * cin * bf              # main input block (double buffered)
    est += 2 * 2 * halo * cin * bf         # left/right halo blocks
    est += tile * k * cin * bf             # im2col scratch
    est += 2 * k * cin * cmid * bf         # packed conv weights
    est += 2 * tile * cout * bf            # output block
    est += tile * cmid * 4                 # f32 accumulator temp
    if layer["w2"] is not None:
        est += 2 * cmid * cout * bf + tile * cmid * bf + tile * cout * 4
    return int(est * 1.25) + (2 << 20)


def _plan(prep, T, tile_t, batch):
    plan = []
    t = T
    for layer in prep["layers"]:
        t_out = (t + 2 * layer["pad"] - layer["dil"] * (layer["kernel"] - 1)
                 - 1) // layer["stride"] + 1
        s = layer["group"]
        t_in_dom = -(-t // s)
        dmax = max(abs(o) for o in layer["offs"])
        halo = _round_up(max(dmax, 1), SUB)
        tile = max(halo, min(_round_up(max(tile_t, 1), halo),
                             _round_up(max(t_out, 1), halo)))
        while tile > halo and _vmem_estimate(tile, halo, layer) > VMEM_BUDGET:
            tile = max(halo, _round_up(tile // 2, halo))
        n = -(-t_out // tile)
        if batch * n < 2 and tile > halo:  # v7x: >= 2 grid steps for 2 cores
            t2 = max(halo, _round_up(tile // 2, halo))
            if t2 < tile:
                tile, n = t2, -(-t_out // t2)
        plan.append(dict(t_in=t_in_dom, t_out=t_out, tile=tile, n=n, halo=halo,
                         read_rows=s * (n * tile + halo),
                         vmem=_vmem_estimate(tile, halo, layer)))
        t = t_out
    return plan


# ---------------------------------------------------------------------------
# Encoder forward (Pallas) — mirrors the nn.Sequential of the PyTorch module
# ---------------------------------------------------------------------------
def encoder_forward_pallas(prep, x_ncw, *, tile_t=1024):
    B, cin, T = x_ncw.shape
    assert cin == prep["cin"]
    layers = prep["layers"]
    plan = _plan(prep, T, tile_t, B)

    # One-time input prep: NCW -> NTC, pad channels to 128 and rows to the
    # first layer's read window (the only host-side pad in the whole forward).
    x = jnp.transpose(x_ncw, (0, 2, 1)).astype(jnp.bfloat16)
    s0 = plan[0]["read_rows"]
    x = jnp.pad(x, ((0, 0), (0, s0 - T), (0, prep["cin_pad"] - cin)))
    in_written = s0
    t_final = T

    for i, (layer, p) in enumerate(zip(layers, plan)):
        s = layer["group"]
        if s > 1:
            # Free row-major reshape: fold the stride into the channel dim.
            rows = x.shape[1]
            x = x.reshape(B, rows // s, s * x.shape[2])
            in_written_dom = in_written // s
        else:
            in_written_dom = in_written

        next_read = plan[i + 1]["read_rows"] if i + 1 < len(plan) else 0
        next_group = layers[i + 1]["group"] if i + 1 < len(layers) else 1
        out_rows = _round_up(max(p["n"] * p["tile"], next_read, 1), next_group)

        x = conv_block(
            x, t_in=p["t_in"], t_out=p["t_out"], tile=p["tile"],
            n_tiles=p["n"], halo=p["halo"], out_rows=out_rows,
            in_written=in_written_dom,
            offs=layer["offs"], w=layer["w"], b=layer["b"],
            w2=layer["w2"], b2=layer["b2"],
            relu_in=layer["relu_in"], relu_out=layer["relu_out"],
            vmem_limit=min(max(p["vmem"], 16 << 20), 32 << 20))

        in_written = p["n"] * p["tile"]
        t_final = p["t_out"]

    y = x[:, :t_final, :prep["cout"]].astype(jnp.float32)
    return jnp.transpose(y, (0, 2, 1))                       # NTC -> NCW


# ---------------------------------------------------------------------------
# Pure-JAX f32 reference (for correctness check)
# ---------------------------------------------------------------------------
def _conv1d_ref(x, w, b, *, stride=1, dilation=1, padding=0):
    y = lax.conv_general_dilated(x, w, (stride,), [(padding, padding)],
                                 rhs_dilation=(dilation,),
                                 dimension_numbers=("NCH", "OIH", "NCH"))
    return y + b[None, :, None]


def encoder_forward_ref(params, x, *, stride_t):
    relu = lambda a: jnp.maximum(a, 0.0)
    p = params["conv_in"]
    x = relu(_conv1d_ref(x, p["w"], p["b"], padding=1))
    pad_t = stride_t // 2
    for d in params["down"]:
        x = _conv1d_ref(x, d["down"]["w"], d["down"]["b"],
                        stride=stride_t, padding=pad_t)
        for blk in d["res"]:
            dil = blk["dilation"]
            h = _conv1d_ref(relu(x), blk["conv1"]["w"], blk["conv1"]["b"],
                            dilation=dil, padding=dil)
            x = _conv1d_ref(relu(h), blk["conv2"]["w"], blk["conv2"]["b"]) + x
    p = params["conv_out"]
    return _conv1d_ref(x, p["w"], p["b"], padding=1)


# ---------------------------------------------------------------------------
if __name__ == "__main__":
    # Small config consistent with the module (defaults scaled down)
    B, input_emb_width, T = 2, 3, 64
    width, output_emb_width = 32, 32
    down_t, stride_t, depth, rate = 2, 2, 2, 3

    key = jax.random.PRNGKey(0)
    k_x, k_p = jax.random.split(key)
    x = jax.random.normal(k_x, (B, input_emb_width, T), jnp.float32)  # NCW

    params = init_encoder_params(k_p, input_emb_width, output_emb_width,
                                 down_t, stride_t, width, depth, rate)
    prep = prepare_encoder_params(params, stride_t)

    y_ref = encoder_forward_ref(params, x, stride_t=stride_t)
    scale = float(jnp.max(jnp.abs(y_ref)))

    ok = True
    # Run with the default (large-tile) plan and with a tiny tile to also
    # exercise the multi-tile / halo-from-previous-tile path.
    for tile_t in (1024, 16):
        y = encoder_forward_pallas(prep, x, tile_t=tile_t)
        y = jax.block_until_ready(y)
        assert y.shape == (B, output_emb_width, T // (stride_t ** down_t)), \
            (tile_t, y.shape)
        err = float(jnp.max(jnp.abs(y - y_ref)))
        good = bool(jnp.all(jnp.isfinite(y))) and err <= 6e-2 * scale + 2e-2
        if not good:
            ok = False
            print(f"mismatch (tile_t={tile_t}): max abs err={err}, "
                  f"scale={scale}")
    if not ok:
        raise SystemExit("FAILED")
    print("KERNEL_OK")
</pallas_src>

<mosaic_0001>
module attributes {stable_mosaic.version = 11 : i64} {
  func.func @_conv_kernel(%arg0: i32, %arg1: i32, %arg2: memref<1x16x128xbf16, #tpu.memory_space<vmem>>, %arg3: memref<1x64x128xbf16, #tpu.memory_space<vmem>>, %arg4: memref<1x16x128xbf16, #tpu.memory_space<vmem>>, %arg5: memref<384x128xbf16, #tpu.memory_space<vmem>>, %arg6: memref<1x128xf32, #tpu.memory_space<vmem>>, %arg7: memref<1x64x128xbf16, #tpu.memory_space<vmem>>, %arg8: memref<64x384xbf16, #tpu.memory_space<vmem>>) attributes {dimension_semantics = [#tpu.dimension_semantics<parallel>, #tpu.dimension_semantics<parallel>], iteration_bounds = array<i64: 2, 1>, scalar_prefetch = 0 : i64, scratch_operands = 1 : i64, tpu.core_type = #tpu.core_type<tc>, window_params = [{transform_indices = @transform_0, window_bounds = array<i64: 1, 16, 128>}, {transform_indices = @transform_1, window_bounds = array<i64: 1, 64, 128>}, {transform_indices = @transform_2, window_bounds = array<i64: 1, 16, 128>}, {pipeline_mode = #tpu.pipeline_mode<synchronous>, transform_indices = @transform_3, window_bounds = array<i64: 384, 128>}, {pipeline_mode = #tpu.pipeline_mode<synchronous>, transform_indices = @transform_4, window_bounds = array<i64: 1, 128>}, {transform_indices = @transform_5, window_bounds = array<i64: 1, 64, 128>}]} {
    %c0 = arith.constant 0 : index
    %c0_0 = arith.constant 0 : index
    %c0_1 = arith.constant 0 : index
    %0 = vector.load %arg3[%c0, %c0_0, %c0_1] : memref<1x64x128xbf16, #tpu.memory_space<vmem>>, vector<1x64x128xbf16>
    %1 = vector.shape_cast %0 : vector<1x64x128xbf16> to vector<64x128xbf16>
    %c0_2 = arith.constant 0 : index
    %c0_3 = arith.constant 0 : index
    %c0_4 = arith.constant 0 : index
    %2 = vector.load %arg4[%c0_2, %c0_3, %c0_4] : memref<1x16x128xbf16, #tpu.memory_space<vmem>>, vector<1x16x128xbf16>
    %3 = vector.shape_cast %2 : vector<1x16x128xbf16> to vector<16x128xbf16>
    %c0_5 = arith.constant 0 : index
    %c0_6 = arith.constant 0 : index
    %c0_7 = arith.constant 0 : index
    %4 = vector.load %arg2[%c0_5, %c0_6, %c0_7] : memref<1x16x128xbf16, #tpu.memory_space<vmem>>, vector<1x16x128xbf16>
    %5 = vector.shape_cast %4 : vector<1x16x128xbf16> to vector<16x128xbf16>
    %c0_i32 = arith.constant 0 : i32
    %6 = arith.cmpi sgt, %arg1, %c0_i32 : i32
    %7 = arith.extui %6 : i1 to i32
    %8 = arith.sitofp %7 : i32 to f32
    %9 = arith.truncf %8 : f32 to bf16
    %10 = vector.broadcast %9 : bf16 to vector<16x128xbf16>
    %11 = arith.mulf %5, %10 : vector<16x128xbf16>
    %12 = vector.extract_strided_slice %11 {offsets = [15, 0], sizes = [1, 128], strides = [1, 1]} : vector<16x128xbf16> to vector<1x128xbf16>
    %c0_8 = arith.constant 0 : index
    %c0_9 = arith.constant 0 : index
    %13 = vector.load %arg8[%c0_8, %c0_9] : memref<64x384xbf16, #tpu.memory_space<vmem>>, vector<1x128xbf16>
    tpu.vector_store %arg8[%c0_8, %c0_9], %12 {strides = array<i32>} : memref<64x384xbf16, #tpu.memory_space<vmem>>, vector<1x128xbf16>,
    %14 = vector.extract_strided_slice %1 {offsets = [0, 0], sizes = [63, 128], strides = [1, 1]} : vector<64x128xbf16> to vector<63x128xbf16>
    %c1 = arith.constant 1 : index
    %c0_10 = arith.constant 0 : index
    %15 = vector.load %arg8[%c1, %c0_10] : memref<64x384xbf16, #tpu.memory_space<vmem>>, vector<63x128xbf16>
    tpu.vector_store %arg8[%c1, %c0_10], %14 {strides = array<i32>} : memref<64x384xbf16, #tpu.memory_space<vmem>>, vector<63x128xbf16>,
    %c0_11 = arith.constant 0 : index
    %c128 = arith.constant 128 : index
    %16 = vector.load %arg8[%c0_11, %c128] : memref<64x384xbf16, #tpu.memory_space<vmem>>, vector<64x128xbf16>
    tpu.vector_store %arg8[%c0_11, %c128], %1 {strides = array<i32>} : memref<64x384xbf16, #tpu.memory_space<vmem>>, vector<64x128xbf16>,
    %17 = vector.extract_strided_slice %1 {offsets = [1, 0], sizes = [63, 128], strides = [1, 1]} : vector<64x128xbf16> to vector<63x128xbf16>
    %c0_12 = arith.constant 0 : index
    %c256 = arith.constant 256 : index
    %18 = vector.load %arg8[%c0_12, %c256] : memref<64x384xbf16, #tpu.memory_space<vmem>>, vector<63x128xbf16>
    tpu.vector_store %arg8[%c0_12, %c256], %17 {strides = array<i32>} : memref<64x384xbf16, #tpu.memory_space<vmem>>, vector<63x128xbf16>,
    %19 = vector.extract_strided_slice %3 {offsets = [0, 0], sizes = [1, 128], strides = [1, 1]} : vector<16x128xbf16> to vector<1x128xbf16>
    %c63 = arith.constant 63 : index
    %c256_13 = arith.constant 256 : index
    %20 = vector.load %arg8[%c63, %c256_13] : memref<64x384xbf16, #tpu.memory_space<vmem>>, vector<1x128xbf16>
    tpu.vector_store %arg8[%c63, %c256_13], %19 {strides = array<i32>} : memref<64x384xbf16, #tpu.memory_space<vmem>>, vector<1x128xbf16>,
    %c0_14 = arith.constant 0 : index
    %c0_15 = arith.constant 0 : index
    %21 = vector.load %arg8[%c0_14, %c0_15] : memref<64x384xbf16, #tpu.memory_space<vmem>>, vector<64x384xbf16>
    %c0_16 = arith.constant 0 : index
    %c0_17 = arith.constant 0 : index
    %22 = vector.load %arg5[%c0_16, %c0_17] : memref<384x128xbf16, #tpu.memory_space<vmem>>, vector<384x128xbf16>
    %cst = arith.constant dense<0.000000e+00> : vector<64x128xf32>
    %23 = tpu.matmul %21, %22, %cst {dimension_numbers = #tpu.dot_dimension_numbers<[1], [0], [0], [1], [0, 0, 1, 1], [], []>} : vector<64x384xbf16>, vector<384x128xbf16>, vector<64x128xf32> -> vector<64x128xf32>
    %c0_18 = arith.constant 0 : index
    %c0_19 = arith.constant 0 : index
    %24 = vector.load %arg6[%c0_18, %c0_19] : memref<1x128xf32, #tpu.memory_space<vmem>>, vector<1x128xf32>
    %25 = vector.broadcast %24 : vector<1x128xf32> to vector<64x128xf32>
    %26 = arith.addf %23, %25 : vector<64x128xf32>
    %cst_20 = arith.constant 0.000000e+00 : f32
    %27 = vector.broadcast %cst_20 : f32 to vector<64x128xf32>
    %28 = arith.maximumf %26, %27 : vector<64x128xf32>
    %29 = arith.truncf %28 : vector<64x128xf32> to vector<64x128xbf16>
    %c0_21 = arith.constant 0 : index
    %c0_22 = arith.constant 0 : index
    %c0_23 = arith.constant 0 : index
    %30 = vector.load %arg7[%c0_21, %c0_22, %c0_23] : memref<1x64x128xbf16, #tpu.memory_space<vmem>>, vector<1x64x128xbf16>
    %31 = vector.shape_cast %30 : vector<1x64x128xbf16> to vector<64x128xbf16>
    %32 = vector.shape_cast %29 : vector<64x128xbf16> to vector<1x64x128xbf16>
    tpu.vector_store %arg7[%c0_21, %c0_22, %c0_23], %32 {strides = array<i32>} : memref<1x64x128xbf16, #tpu.memory_space<vmem>>, vector<1x64x128xbf16>,
    return
  }
  func.func @transform_0(%arg0: i32, %arg1: i32) -> (i32, i32, i32) {
    %c4_i32 = arith.constant 4 : i32
    %0 = arith.muli %arg1, %c4_i32 : i32
    %c1_i32 = arith.constant 1 : i32
    %1 = arith.subi %0, %c1_i32 : i32
    %c0_i32 = arith.constant 0 : i32
    %2 = arith.maxsi %1, %c0_i32 : i32
    %c0_i32_0 = arith.constant 0 : i32
    %c0_i32_1 = arith.constant 0 : i32
    return %arg0, %2, %c0_i32_0 : i32, i32, i32
  }
  func.func @transform_1(%arg0: i32, %arg1: i32) -> (i32, i32, i32) {
    %c0_i32 = arith.constant 0 : i32
    %c0_i32_0 = arith.constant 0 : i32
    return %arg0, %arg1, %c0_i32 : i32, i32, i32
  }
  func.func @transform_2(%arg0: i32, %arg1: i32) -> (i32, i32, i32) {
    %c1_i32 = arith.constant 1 : i32
    %0 = arith.addi %arg1, %c1_i32 : i32
    %c4_i32 = arith.constant 4 : i32
    %1 = arith.muli %0, %c4_i32 : i32
    %c0_i32 = arith.constant 0 : i32
    %c0_i32_0 = arith.constant 0 : i32
    return %arg0, %1, %c0_i32 : i32, i32, i32
  }
  func.func @transform_3(%arg0: i32, %arg1: i32) -> (i32, i32) {
    %c0_i32 = arith.constant 0 : i32
    %c0_i32_0 = arith.constant 0 : i32
    %c0_i32_1 = arith.constant 0 : i32
    return %c0_i32, %c0_i32_0 : i32, i32
  }
  func.func @transform_4(%arg0: i32, %arg1: i32) -> (i32, i32) {
    %c0_i32 = arith.constant 0 : i32
    %c0_i32_0 = arith.constant 0 : i32
    %c0_i32_1 = arith.constant 0 : i32
    return %c0_i32, %c0_i32_0 : i32, i32
  }
  func.func @transform_5(%arg0: i32, %arg1: i32) -> (i32, i32, i32) {
    %c0_i32 = arith.constant 0 : i32
    %c0_i32_0 = arith.constant 0 : i32
    return %arg0, %arg1, %c0_i32 : i32, i32, i32
  }
}

</mosaic_0001>

<bundles_post_ra>
// kernel: tpu_custom_call.1
= control target key start
LH: loop header
LB: loop body
LE: loop exit
PB: predicated region body
PF: predicated region fallthrough
CT: control target
= control target key end

     0   :  { %s2021_s0 = inlined_call_operand.hbm [shape: bf16[2,80,128], index: 0, kind: input, shape index: {}]   ;;  %s2022_s1 = inlined_call_operand.hbm [shape: bf16[2,80,128], index: 1, kind: input, shape index: {}]   ;;  %s2023_s2 = inlined_call_operand.hbm [shape: bf16[2,80,128], index: 2, kind: input, shape index: {}]   ;;  %s2024_s3 = inlined_call_operand.hbm [shape: bf16[384,128], index: 3, kind: input, shape index: {}]   ;;  %s2025_s4 = inlined_call_operand.vmem [shape: f32[1,128], index: 4, kind: input, shape index: {}]   ;;  %s2026_s5 = inlined_call_operand.hbm [shape: bf16[2,96,128], index: 5, kind: output, shape index: {}]  }
   0x1   :  { %2047 = sst [smem:[#allocation23_spill]] %s2022_s1 }
   0x2   :  { %10 = vsyncpa [#allocation4], 0 }
   0x3   :  { %12 = vsyncpa [#allocation4 + $0x1], 0 }
   0x4   :  { %13 = vsyncpa [#allocation7], 0 }
   0x5   :  { %15 = vsyncpa [#allocation7 + $0x1], 0 }
   0x6   :  { %16 = vsyncpa [#allocation10], 0 }
   0x7   :  { %17 = vsyncpa [#allocation5], 0 }
   0x8   :  { %19 = vsyncpa [#allocation5 + $0x1], 0  ;;  %s1649_s18 = smov 0   ;;  %s1651_s19 = smov 0  }
   0x9   :  { %s1653_s20 = smov 0   ;;  %s1655_s21 = smov 0  }
   0xa   :  { %s1657_s22 = smov 0   ;;  %s1659_s23 = smov 0  }
   0xb LB: > { %2048 = sst [smem:[#allocation16_spill]] %s1588_s18  ;;  %s37_s24 = sadd.s32 1, %s1604_s22  ;;  %s1608_s23 = sphi %s1659_s23, %s25_s23   ;;  %s1604_s22 = sphi %s1657_s22, %s2084_s22   ;;  %s1600_s21 = sphi %s1655_s21, %s2083_s21   ;;  %s1596_s20 = sphi %s1653_s20, %s2082_s20   ;;  %s1592_s19 = sphi %s1651_s19, %s2086_s19   ;;  %s1588_s18 = sphi %s1649_s18, %s2085_s18  }
   0xc   : > { %2049 = sst [smem:[#allocation17_spill]] %s1596_s20  ;;  %s54_s25 = sadd.s32 1, %s1596_s20 }
   0xd   : > { %2050 = sst [smem:[#allocation18_spill]] %s1604_s22  ;;  %p39_p0 = scmp.ge.s32.totalorder %s37_s24, 2 }
   0xe   : > { %2051 = sst [smem:[#allocation19_spill]] %s1608_s23  ;;  %p2027_p1 = scmp.ne.s32.totalorder %s1596_s20, %s1592_s19 }
   0xf   : > { %p62_p2 = scmp.eq.s32.totalorder %s1608_s23, 0  ;;  %s2088_s24 = smov (%p39_p0, %s37_s24), 0 }
  0x10   : > { %2052 = sst [smem:[#allocation20_spill]] %s2088_s24  ;;  %s49_s26 = ssub.s32 %s1604_s22, %s2088_s24 }
  0x11   : > { %p63_p3 = por %p62_p2, %p2027_p1  ;;  %p52_p5 = scmp.eq.s32.totalorder %s49_s26, 0 }
  0x12   : > { %p1314_p6 = scmp.lt.s32.totalorder %s1608_s23, 2  ;;  %s1694_s27 = sand.u32 1, %s1596_s20  }
  0x13   : > { %s1697_s28 = smul.u32 640, %s1604_s22  ;;  %s264_s6 = sand.u32 1, %s1608_s23  }
  0x14   : > { %s1700_s29 = scalar_select %p52_p5, %s1596_s20, %s54_s25  }
  0x15   : > { %p1702_p7 = pnand %p1314_p6, %p63_p3  ;;  %s1120_s7 = sshll.u32 %s1694_s27, 5 }
  0x16   : > { %2053 = sst [smem:[#allocation21_spill]] %s1700_s29  ;;  %s2055_s1 = sld [smem:[#allocation23_spill]] }
  0x17   : > { %s2054_s30 = scalar_select %p1702_p7, 1, 0 }
  0x18   : > { %s268_s11 = scalar_lea.vmem [#allocation6], %s1120_s7  ;;  %s1716_s13 = scalar_lea.sflag [#allocation7], %s264_s6 }
  0x19   : > { %s283_s12 = sshll.u32 %s268_s11, 4  ;;  %p1722_p9 = pneg %p1702_p7  ;;  %s1714_s12 = int_to_ptr.vmem [resolvable:$true] %s283_s12 }
  0x1b   : > { %s2056_s15 = scalar_select %p1722_p9, 1, 0 }
  0x1c   : > { %s1712_s10 = scalar_lea.hbm %s2055_s1, %s1697_s28  ;;  %s1404_s25 = scalar_lea.hbm %s2055_s1, 1280 }
  0x1d   : > { %s1399_s14 = scalar_lea.hbm %s1712_s10, 512  ;;  %p1405_p12 = scmp.lt.u32.totalorder %s1712_s10, %s2055_s1 }
  0x1e   : > { %p1400_p8 = scmp.ne.s32.totalorder %s1712_s10, %s1399_s14  ;;  %p1406_p13 = scmp.lt.u32.totalorder %s1404_s25, %s1399_s14 }
  0x1f   : > { %p1408_p2 = scmp.lt.u32.totalorder %s1399_s14, %s1712_s10 }
  0x20   : > { %p1402_p10 = pnand %p1722_p9, %p1400_p8  ;;  %p1407_p0 = por %p1406_p13, %p1405_p12 }
  0x22   : > { %p1403_p11 = pneg %p1402_p10  ;;  %p1409_p3 = por %p1408_p2, %p1407_p0 }
  0x24   : > { %p1410_p5 = pnand %p1409_p3, %p1403_p11 }
  0x26   : > { %1413 = shalt.err (!%p1410_p5)
}
  0x27   : > { %s1414_s6 = scalar_lea.vmem %s1714_s12, 512  ;;  %s1610_s8 = smov [#allocation6]  }
  0x28   : > { %p1415_p6 = scmp.ne.s32.totalorder %s1714_s12, %s1414_s6  ;;  %s1419_s9 = sshll.u32 %s1610_s8, 4  ;;  %s1420_s9 = int_to_ptr.vmem [resolvable:$false] %s1419_s9 }
  0x29   : > { %s1421_s11 = scalar_lea.vmem %s1420_s9, 1024  ;;  %p1422_p4 = scmp.lt.s32.totalorder %s1714_s12, %s1420_s9 }
  0x2a   : > { %p1417_p8 = pnand %p1415_p6, %p1722_p9  ;;  %p1423_p1 = scmp.lt.s32.totalorder %s1421_s11, %s1414_s6 }
  0x2c   : > { %p1418_p10 = pneg %p1417_p8  ;;  %p1424_p12 = por %p1423_p1, %p1422_p4 }
  0x2e   : > { %p1425_p13 = pnand %p1424_p12, %p1418_p10 }
  0x30   : > { %1428 = shalt.err (!%p1425_p13)
}
  0x31   : > { %s2028_s14 = smov 64   ;;  %s2030_s16 = smov 4  }
  0x32   : > { %1305 = dma.hbm_to_vmem [thread:$0]  (!%p1702_p7), %s1712_s10, 512, %s1714_s12, %s1716_s13, %s2028_s14, %s2028_s14, %s2030_s16  }
  0x33   : > { %s1750_s17 = sadd.s32 4294967295, %s1608_s23   ;;  %s1114_s25 = sadd.s32 4294967294, %s1608_s23  }
  0x34   : > { %p67_p1 = scmp.ne.s32.totalorder %s1592_s19, %s1588_s18  ;;  %p2038_p4 = scmp.eq.s32.totalorder %s1750_s17, 0 }
  0x35   : > { %p195_p11 = scmp.eq.s32.totalorder %s1750_s17, 1  ;;  %p201_p0 = scmp.eq.s32.totalorder %s1114_s25, 1 }
  0x36   : > { %p1115_p2 = scmp.ge.s32.totalorder %s1608_s23, 1  ;;  %p1760_p3 = por %p2038_p4, %p67_p1 }
  0x37   : > { %p2058_p5 = scmp.ne.s32.totalorder %s1596_s20, %s1592_s19  ;;  %p1771_p8 = por %p201_p0, %p67_p1 }
  0x38   : > { %s2057_s26 = scalar_select %p1760_p3, 1, 0 }
  0x39   : > { %p1767_p6 = por %p195_p11, %p2058_p5  ;;  %p208_p10 = scmp.lt.s32.totalorder %s1608_s23, 3 }
  0x3a   : > { %s2060_s12 = scalar_select %p1771_p8, 1, 0 }
  0x3b   : > { %s2059_s10 = scalar_select %p1767_p6, 1, 0 }
  0x3c   : > { %2061 = sst [smem:[#allocation22_spill]] %s2060_s12  ;;  %p1776_p12 = pnand %p1115_p2, %p208_p10 }
  0x3d   : > { %s1613_s6 = smov [#allocation9]   ;;  %s1118_s9 = sshll.u32 %s1694_s27, 3 }
  0x3e   : > { %s2062_s7 = scalar_select %p1776_p12, 1, 0 }
  0x3f   : > { %s220_s8 = sshll.u32 %s1613_s6, 4  ;;  %p1295_p13 = pneg %p1776_p12  ;;  %s1780_s8 = int_to_ptr.vmem [resolvable:$true] %s220_s8 }
  0x40   : > { %s1789_s14 = scalar_lea.hbm %s2021_s0, %s1697_s28  ;;  %s241_s1 = scalar_lea.vmem [#allocation3], %s1118_s9 }
  0x41   : > { %p1793_p1 = pnand %p1295_p13, %p2038_p4  ;;  %s254_s24 = sshll.u32 %s241_s1, 4  ;;  %s1797_s24 = int_to_ptr.vmem [resolvable:$true] %s254_s24 }
  0x42   : > { %s1799_s6 = scalar_lea.vmem [#allocation8], %s1118_s9  ;;  %s1429_s11 = scalar_lea.hbm %s2024_s3, 3072 }
  0x43   : > { %p1430_p11 = scmp.ne.s32.totalorder %s2024_s3, %s1429_s11  ;;  %p1431_p0 = pneg %p1793_p1 }
  0x44   : > { %p1436_p10 = scmp.lt.u32.totalorder %s1429_s11, %s2024_s3 }
  0x45   : > { %p1432_p2 = pnand %p1431_p0, %p1430_p11 }
  0x47   : > { %p1433_p5 = pneg %p1432_p2 }
  0x49   : > { %p1438_p13 = pnand %p1436_p10, %p1433_p5 }
  0x4b   : > { %1441 = shalt.err (!%p1438_p13)
}
  0x4c   : > { %s1442_s9 = scalar_lea.vmem %s1780_s8, 3072  ;;  %p1450_p3 = scmp.lt.s32.totalorder %s1780_s8, %s1780_s8 }
  0x4d   : > { %p1443_p4 = scmp.ne.s32.totalorder %s1780_s8, %s1442_s9  ;;  %p1451_p12 = scmp.lt.s32.totalorder %s1442_s9, %s1442_s9 }
  0x4f   : > { %p1445_p8 = pnand %p1443_p4, %p1431_p0  ;;  %p1452_p7 = por %p1451_p12, %p1450_p3 }
  0x51   : > { %p1446_p6 = pneg %p1445_p8 }
  0x53   : > { %p1453_p9 = pnand %p1452_p7, %p1446_p6 }
  0x55   : > { %1456 = shalt.err (!%p1453_p9)
}
  0x56   : > { %s2064_s20 = smov 4   ;;  %s2065_s23 = smov 64  }
  0x57   : > { %1298 = dma.hbm_to_vmem [thread:$0]  (!%p1793_p1), %s2024_s3, 3072, %s1780_s8, [#allocation10], %s2065_s23, %s2065_s23, %s2064_s20  }
  0x58   : > { %s238_s11 = scalar_lea.sflag [#allocation4], %s1694_s27  ;;  %s1457_s25 = scalar_lea.hbm %s1789_s14, 128 }
  0x59   : > { %p1458_p7 = scmp.ne.s32.totalorder %s1789_s14, %s1457_s25  ;;  %p2066_p9 = scmp.ne.s32.totalorder %s2056_s15, 0 }
  0x5a   : > { %s1462_s9 = scalar_lea.hbm %s2021_s0, 1280  ;;  %p1463_p6 = scmp.lt.u32.totalorder %s1789_s14, %s2021_s0 }
  0x5b   : > { %p1460_p4 = pnand %p1458_p7, %p2066_p9  ;;  %p1464_p8 = scmp.lt.u32.totalorder %s1462_s9, %s1457_s25 }
  0x5c   : > { %p1466_p11 = scmp.lt.u32.totalorder %s1457_s25, %s1789_s14 }
  0x5d   : > { %p1461_p3 = pneg %p1460_p4  ;;  %p1465_p12 = por %p1464_p8, %p1463_p6 }
  0x5f   : > { %p1467_p0 = por %p1466_p11, %p1465_p12 }
  0x61   : > { %p1468_p2 = pnand %p1467_p0, %p1461_p3 }
  0x63   : > { %1471 = shalt.err (!%p1468_p2)
}
  0x64   : > { %s1472_s8 = scalar_lea.vmem %s1797_s24, 128  ;;  %s1614_s29 = smov [#allocation3]  }
  0x65   : > { %p1473_p1 = scmp.ne.s32.totalorder %s1797_s24, %s1472_s8  ;;  %s1477_s12 = sshll.u32 %s1614_s29, 4  ;;  %s1478_s12 = int_to_ptr.vmem [resolvable:$false] %s1477_s12 }
  0x66   : > { %s1479_s18 = scalar_lea.vmem %s1478_s12, 256  ;;  %p1480_p13 = scmp.lt.s32.totalorder %s1797_s24, %s1478_s12 }
  0x67   : > { %p1475_p5 = pnand %p1473_p1, %p2066_p9  ;;  %p1481_p7 = scmp.lt.s32.totalorder %s1479_s18, %s1472_s8 }
  0x69   : > { %p1476_p10 = pneg %p1475_p5  ;;  %p1482_p4 = por %p1481_p7, %p1480_p13 }
  0x6b   : > { %p1483_p6 = pnand %p1482_p4, %p1476_p10 }
  0x6d   : > { %1486 = shalt.err (!%p1483_p6)
}
  0x6e   : > { %p2067_p3 = scmp.ne.s32.totalorder %s2054_s30, 0  ;;  %s2068_s22 = sshll.u32 %s1799_s6, 4  ;;  %s1855_s22 = int_to_ptr.vmem [resolvable:$true] %s2068_s22 }
  0x6f   : > { %s1020_s1 = scalar_lea.hbm %s2023_s2, %s1697_s28 }
  0x70   : > { %1302 = dma.hbm_to_vmem [thread:$0]  (!%p2067_p3), %s1789_s14, 128, %s1797_s24, %s238_s11, %s2065_s23, %s2065_s23, %s2064_s20  }
  0x71   : > { %s1861_s9 = scalar_lea.hbm %s1020_s1, 512  ;;  %s1517_s8 = scalar_lea.hbm %s1020_s1, 640 }
  0x72   : > { %p1488_p8 = scmp.ne.s32.totalorder %s1861_s9, %s1517_s8  ;;  %s1492_s24 = scalar_lea.hbm %s2023_s2, 1280 }
  0x73   : > { %p1493_p0 = scmp.lt.u32.totalorder %s1861_s9, %s2023_s2  ;;  %p1494_p2 = scmp.lt.u32.totalorder %s1492_s24, %s1517_s8 }
  0x74   : > { %p1490_p12 = pnand %p1488_p8, %p2066_p9  ;;  %p1496_p5 = scmp.lt.u32.totalorder %s1517_s8, %s1861_s9 }
  0x75   : > { %p1495_p1 = por %p1494_p2, %p1493_p0 }
  0x76   : > { %p1491_p11 = pneg %p1490_p12 }
  0x77   : > { %p1497_p10 = por %p1496_p5, %p1495_p1 }
  0x79   : > { %p1498_p13 = pnand %p1497_p10, %p1491_p11 }
  0x7b   : > { %1501 = shalt.err (!%p1498_p13)
}
  0x7c   : > { %s1502_s28 = scalar_lea.vmem %s1855_s22, 128  ;;  %s1615_s11 = smov [#allocation8]  }
  0x7d   : > { %p1503_p7 = scmp.ne.s32.totalorder %s1855_s22, %s1502_s28  ;;  %s1507_s12 = sshll.u32 %s1615_s11, 4  ;;  %s1508_s12 = int_to_ptr.vmem [resolvable:$false] %s1507_s12 }
  0x7e   : > { %s1509_s18 = scalar_lea.vmem %s1508_s12, 256  ;;  %p1510_p8 = scmp.lt.s32.totalorder %s1855_s22, %s1508_s12 }
  0x7f   : > { %p1505_p4 = pnand %p1503_p7, %p2066_p9  ;;  %p1511_p12 = scmp.lt.s32.totalorder %s1509_s18, %s1502_s28 }
  0x81   : > { %p1506_p6 = pneg %p1505_p4  ;;  %p1512_p0 = por %p1511_p12, %p1510_p8 }
  0x83   : > { %p1513_p2 = pnand %p1512_p0, %p1506_p6 }
  0x85   : > { %1516 = shalt.err (!%p1513_p2)
}
  0x86   : > { %1308 = dma.hbm_to_vmem [thread:$0]  (!%p2067_p3), %s1861_s9, 128, %s1855_s22, %s1716_s13, %s2065_s23, %s2065_s23, %s2064_s20  }
  0x87   : > { %p2069_p9 = scmp.ne.s32.totalorder %s2062_s7, 0 }
  0x88   : > { %s1890_s15 = sand.u32 (!%p2069_p9), 1, %s1592_s19   ;;  %p2070_p11 = scmp.ne.s32.totalorder (!%p2069_p9), %s2057_s26, 0 }
  0x89   : > { %320 = sbr.rel (%p2069_p9) target bundleno = 448 (0x1c0), region = 40  ;;  %s1125_s25 = sshll.u32 (!%p2069_p9), %s1890_s15, 3 }
  0x8a   : > { %s323_s16 = scalar_lea.sflag (!%p2069_p9), [#allocation4], %s1890_s15  ;;  %s1894_s1 = scalar_lea.vmem (!%p2069_p9), [#allocation3], %s1125_s25 }
  0x90   : > { %1571 = dma.done.wait (%p2070_p11), %s323_s16, 128  }
  0x91   : > { %1573 = vsyncadd (%p2070_p11), %s323_s16, 4294967168  ;;  %s331_s30 = sand.u32 1, %s1750_s17   ;;  %s1126_s13 = sshll.u32 %s1890_s15, 5 }
  0x92   : > { %s332_s7 = scalar_lea.sflag [#allocation7], %s331_s30  ;;  %s1904_s20 = scalar_lea.vmem [#allocation6], %s1126_s13 }
  0x93   : > { %1575 = dma.done.wait (%p2070_p11), %s332_s7, 640  }
  0x94   : > { %1577 = vsyncadd (%p2070_p11), %s332_s7, 4294966656  ;;  %s1910_s23 = scalar_lea.vmem [#allocation8], %s1125_s25  ;;  %p2071_p3 = scmp.eq.s32.totalorder %s1750_s17, 0 }
  0x96   : > { %1579 = dma.done.wait (%p2071_p3), [#allocation10], 3072   ;;  %p2072_p1 = pmov %p2071_p3 }
  0x97   : > { %v1370_v0 = vld [vmem:[#allocation9 + $0x40] sm:$0xff]   ;;  %v1372_v2 = vld [vmem:[#allocation9 + $0x48] sm:$0xff]   ;;  %v1375_v5 = vld [vmem:[#allocation9 + $0x50] sm:$0xff]   ;;  %vm441_vm0 = vsmask.f32 256  ;;  %vm440_vm2 = vcmask 1040384  }
  0x98   : > { %1581 = vsyncadd (%p2072_p1), [#allocation10], 4294964224  ;;  %v1371_v1 = vld [vmem:[#allocation9] sm:$0xff]   ;;  %1204 = vmatprep.subr.bf16.mxu0 %v1370_v0  ;;  %v1374_v4 = vld [vmem:[#allocation9 + $0x8] sm:$0xff]   ;;  %vm518_vm1 = vsmask.f32 7424 }
  0x99   : > { %1205 = vmatpush3.bf16.msra.mxu0 %v1371_v1  ;;  %v1373_v3 = vld [vmem:[#allocation9 + $0x80] sm:$0xff]   ;;  %v1376_v6 = vld [vmem:[#allocation9 + $0x88] sm:$0xff]   ;;  %v1377_v7 = vld [vmem:[#allocation9 + $0x10] sm:$0xff]   ;;  %vm501_vm4 = vcmask 1047552   ;;  %vm502_vm6 = vsmask.f32 7938 }
  0x9a   : > { %1206 = vmatprep.subr.bf16.mxu0 %v1372_v2  ;;  %1256 = vmatprep.subr.bf16.mxu1 %v1373_v3  ;;  %v1378_v8 = vld [vmem:[#allocation9 + $0x58] sm:$0xff]   ;;  %v1379_v9 = vld [vmem:[#allocation9 + $0x90] sm:$0xff]   ;;  %v1381_v11 = vld [vmem:[#allocation9 + $0x60] sm:$0xff]   ;;  %vm549_vm8 = vcmask 1047559   ;;  %vm550_vm9 = vsmask.f32 7966 }
  0x9b   : > { %1257 = vmatpush3.bf16.msra.mxu1 %v1373_v3  ;;  %v1380_v10 = vld [vmem:[#allocation9 + $0x18] sm:$0xff]   ;;  %v1383_v13 = vld [vmem:[#allocation9 + $0x20] sm:$0xff]   ;;  %v1384_v15 = vld [vmem:[#allocation9 + $0x68] sm:$0xff]   ;;  %s1959_s22 = scalar_lea.vmem [#allocation11], %s1126_s13  ;;  %s1282_s8 = smul.u32 768, %s1600_s21 }
  0x9c   : > { %1258 = vmatprep.subr.bf16.mxu1 %v1376_v6  ;;  %v1382_v12 = vld [vmem:[#allocation9 + $0x98] sm:$0xff]   ;;  %v1385_v14 = vld [vmem:[#allocation9 + $0xa0] sm:$0xff]   ;;  %v1386_v16 = vld [vmem:[#allocation9 + $0x28] sm:$0xff]   ;;  %s966_s9 = sshll.u32 %s1959_s22, 4  ;;  %s945_s14 = scalar_lea.sflag [#allocation5], %s1890_s15  ;;  %s1966_s9 = int_to_ptr.vmem [resolvable:$true] %s966_s9 }
  0x9d   : > { %1207 = vmatpush3.bf16.msra.mxu0 %v1374_v4  ;;  %v1388_v17 = vld [vmem:[#allocation9 + $0xa8] sm:$0xff]   ;;  %v1387_v18 = vld [vmem:[#allocation9 + $0x70] sm:$0xff]   ;;  %v1390_v22 = vld [vmem:[#allocation9 + $0x78] sm:$0xff]   ;;  %s1971_s24 = scalar_lea.hbm %s2026_s5, %s1282_s8  ;;  %s1518_s6 = scalar_lea.vmem %s1966_s9, 512 }
  0x9e   : > { %1208 = vmatprep.subr.bf16.mxu0 %v1375_v5  ;;  %v1389_v19 = vld [vmem:[#allocation9 + $0x30] sm:$0xff]   ;;  %v413_v23 = vld [vmem:[%s1894_s1 + $0x4] sm:$0xf]  ;;  %v1392_v24 = vld [vmem:[#allocation9 + $0x38] sm:$0xff]   ;;  %p1519_p5 = scmp.ne.s32.totalorder %s1966_s9, %s1518_s6  ;;  %p2075_p10 = scmp.ne.s32.totalorder %s2059_s10, 0 }
  0x9f   : > { %1259 = vmatpush3.bf16.msra.mxu1 %v1376_v6  ;;  %v1391_v20 = vld [vmem:[#allocation9 + $0xb0] sm:$0xff]   ;;  %v431_v26 = vmul.bf16 0.0, %v413_v23  ;;  %v1924_v28 = vld [vmem:[%s1904_s20 + $0x8] sm:$0xff]   ;;  %v1396_v33 = vld [vmem:[%s1904_s20 + $0x10] sm:$0xff]   ;;  %s1616_s21 = smov [#allocation11]  }
  0xa0   : > { %1260 = vmatprep.subr.bf16.mxu1 %v1379_v9  ;;  %v1917_v21 = vld [vmem:[%s1904_s20] sm:$0xff]   ;;  %v1394_v30 = vld [vmem:[#allocation9 + $0xb8] sm:$0xff]   ;;  %v477_v32 = vshll.u32 %v1924_v28, 16  ;;  %v474_v34 = vshrl.u32 %v1924_v28, 16  ;;  %v1930_v35 = vld [vmem:[%s1904_s20 + $0x18] sm:$0xff]   ;;  %v485_v41 = vshll.u32 %v1396_v33, 16  ;;  %p1520_p13 = pnand %p1519_p5, %p2075_p10 }
  0xa1   : > { %1209 = vmatpush3.bf16.msra.mxu0 %v1377_v7  ;;  %v470_v25 = vshll.u32 %v1917_v21, 16  ;;  %798 = vmatprep.mubr.bf16.mxu0 %v1917_v21  ;;  %v467_v27 = vshrl.u32 %v1917_v21, 16  ;;  %v1130_v29 = vcombine.low %v431_v26, %v431_v26  ;;  %vm1934_vm3 = vmand %vm440_vm2, %vm441_vm0  ;;  %v443_v39 = vld [vmem:[#allocation2] sm:$0x1]  ;;  %v482_v43 = vshrl.u32 %v1396_v33, 16  ;;  %v538_v58 = vld [vmem:[#allocation2 + $0x58] sm:$0xff] }
  0xa2   : > { %1210 = vmatprep.subr.bf16.mxu0 %v1378_v8  ;;  %v521_v40 = vrot.slane %v477_v32, 1  ;;  %v476_v42 = vrot.slane %v474_v34, 7  ;;  %v493_v46 = vshll.u32 %v1930_v35, 16  ;;  %v490_v47 = vshrl.u32 %v1930_v35, 16  ;;  %vm537_vm5 = vmand %vm501_vm4, %vm518_vm1  ;;  %v1398_v59 = vld [vmem:[%s1910_s23] ss:$0 sps:$4 sm:$0xff]   ;;  %p1521_p7 = pneg %p1520_p13 }
  0xa3   : > { %1261 = vmatpush3.bf16.msra.mxu1 %v1379_v9  ;;  %v519_v31 = vrot.slane %v470_v25, 1  ;;  %v436_v36 = vshrl.u32 %v1130_v29, 16  ;;  %v469_v44 = vrot.slane %v467_v27, 7  ;;  %v524_v50 = vrot.slane %v485_v41, 1  ;;  %vm503_vm7 = vmand %vm501_vm4, %vm502_vm6  ;;  %s1522_s28 = sshll.u32 %s1616_s21, 4  ;;  %s1523_s28 = int_to_ptr.vmem [resolvable:$false] %s1522_s28 }
  0xa4   : > { %1262 = vmatprep.subr.bf16.mxu1 %v1382_v12  ;;  %v523_v49 = vor.u32 %v521_v40, %v474_v34  ;;  %v479_v51 = vor.u32 %v477_v32, %v476_v42  ;;  %v484_v53 = vrot.slane %v482_v43, 7  ;;  %v527_v54 = vrot.slane %v493_v46, 1  ;;  %vm551_vm10 = vmand %vm549_vm8, %vm550_vm9  ;;  %s1524_s11 = scalar_lea.vmem %s1523_s28, 1024  ;;  %p1525_p4 = scmp.lt.s32.totalorder %s1966_s9, %s1523_s28 }
  0xa5   : > { %1211 = vmatpush3.bf16.msra.mxu0 %v1380_v10  ;;  %v520_v37 = vor.u32 %v519_v31, %v467_v27  ;;  %v438_v45 = vrot.slane %v436_v36, 3  ;;  %v526_v57 = vor.u32 %v524_v50, %v482_v43  ;;  %v492_v60 = vrot.slane %v490_v47, 7  ;;  %p1526_p6 = scmp.lt.s32.totalorder %s1524_s11, %s1518_s6 }
  0xa6   : > { %1212 = vmatprep.subr.bf16.mxu0 %v1381_v11  ;;  %v525_v55 = vsel %vm518_vm1, %v523_v49, %v524_v50  ;;  %v480_v56 = vsel %vm441_vm0, %v469_v44, %v479_v51  ;;  %v487_v61 = vor.u32 %v485_v41, %v484_v53  ;;  %v529_v62 = vor.u32 %v527_v54, %v490_v47 }
  0xa7   : > { %1263 = vmatpush3.bf16.msra.mxu1 %v1382_v12  ;;  %v522_v48 = vsel %vm518_vm1, %v520_v37, %v521_v40  ;;  %v444_v52 = vsel %vm1934_vm3, %v438_v45, %v443_v39  ;;  %v528_v63 = vsel %vm518_vm1, %v526_v57, %v527_v54  ;;  %v495_v0 = vor.u32 %v493_v46, %v492_v60  ;;  %p1527_p8 = por %p1526_p6, %p1525_p4 }
  0xa8   : > { %1264 = vmatprep.subr.bf16.mxu1 %v1385_v14  ;;  %1272 = vmatprep.mubr.bf16.mxu1 %v522_v48  ;;  %445 = vst [vmem:[#allocation2] sm:$0x1] %v444_v52  ;;  %v488_v1 = vsel %vm441_vm0, %v476_v42, %v487_v61  ;;  %v539_v2 = vsel %vm537_vm5, %v529_v62, %v538_v58  ;;  %v545_v4 = vshll.u32 %v1398_v59, 16 }
  0xa9   : > { %1213 = vmatpush3.bf16.msra.mxu0 %v1383_v13  ;;  %v472_v3 = vor.u32 %v470_v25, %v469_v44  ;;  %540 = vst [vmem:[#allocation2 + $0x58] sm:$0xff] %v539_v2  ;;  %v496_v5 = vsel %vm441_vm0, %v484_v53, %v495_v0  ;;  %p1528_p12 = pnand %p1527_p8, %p1521_p7 }
  0xaa   : > { %1214 = vmatprep.subr.bf16.mxu0 %v1384_v15  ;;  %v547_v8 = vrot.slane %v545_v4, 1 }
  0xab   : > { %1265 = vmatpush3.bf16.msra.mxu1 %v1385_v14 }
  0xac   : > { %1266 = vmatprep.subr.bf16.mxu1 %v1388_v17 }
  0xad   : > { %1215 = vmatpush3.bf16.msra.mxu0 %v1386_v16 }
  0xae   : > { %1216 = vmatprep.subr.bf16.mxu0 %v1387_v18  ;;  %v1136_v18 = vld [vmem:[%s2025_s4] ss:$0 sm:$0xff] }
  0xaf   : > { %1267 = vmatpush3.bf16.msra.mxu1 %v1388_v17  ;;  %v504_v6 = vld [vmem:[#allocation2] sm:$0xff] }
  0xb0   : > { %1268 = vmatprep.subr.bf16.mxu1 %v1391_v20  ;;  %v505_v7 = vsel %vm503_vm7, %v472_v3, %v504_v6  ;;  %v552_v9 = vld [vmem:[#allocation2 + $0x58] sm:$0x80] }
  0xb1   : > { %1217 = vmatpush3.bf16.msra.mxu0 %v1389_v19  ;;  %506 = vst [vmem:[#allocation2] sm:$0xff] %v505_v7  ;;  %v553_v10 = vsel %vm551_vm10, %v547_v8, %v552_v9 }
  0xb2   : > { %1218 = vmatprep.subr.bf16.mxu0 %v1390_v22  ;;  %554 = vst [vmem:[#allocation2 + $0x58] sm:$0x80] %v553_v10 }
  0xb3   : > { %1269 = vmatpush3.bf16.msra.mxu1 %v1391_v20 }
  0xb4   : > { %1270 = vmatprep.subr.bf16.mxu1 %v1394_v30 }
  0xb5   : > { %1219 = vmatpush3.bf16.msra.mxu0 %v1392_v24 }
  0xb7   : > { %1271 = vmatpush3.bf16.msra.mxu1 %v1394_v30 }
  0xb8   : > { %799 = vmatmul.mubr.bf16.vlgmr.msra.gmra.mrb[0].mxu0 %v505_v7 }
  0xb9   : > { %806 = vmatprep.mubr.bf16.mxu0 %v1924_v28  ;;  %v566_v11 = vld [vmem:[#allocation2 + $0x58] sm:$0xff] }
  0xba   : > { %1273 = vmatmul.mubr.bf16.vlgmr.msra.gmra.mrb[0].mxu1 %v525_v55 }
  0xbb   : > { %1276 = vmatprep.mubr.bf16.mxu1 %v528_v63 }
  0xc0   : > { %807 = vmatmul.mubr.bf16.gmra.mrb[4].mxu0 %v480_v56 }
  0xc1   : > { %814 = vmatprep.mubr.bf16.mxu0 %v1396_v33 }
  0xc2   : > { %1277 = vmatmul.mubr.bf16.gmra.mrb[4].mxu1 %v566_v11 }
  0xc8   : > { %815 = vmatmul.mubr.bf16.gmra.mrb[8].mxu0 %v488_v1 }
  0xc9   : > { %822 = vmatprep.mubr.bf16.mxu0 %v1930_v35 }
  0xd0   : > { %823 = vmatmul.mubr.bf16.gmra.mrb[12].mxu0 %v496_v5 }
 0x18b   : > { %v1220_v16 = vpop.f32.mrb[0].mxu0 }
 0x18c   : > { %v1221_v17 = vpop.f32.mrb[1].mxu0 }
 0x18d   : > { %v1274_v12 = vpop.f32.mrb[0].mxu1  ;;  %v1222_v19 = vadd.f32 %v1221_v17, %v1220_v16  ;;  %v1223_v20 = vpop.f32.mrb[2].mxu0 }
 0x18e   : > { %v865_v13 = vpop.f32.mrb[1].mxu1  ;;  %v1224_v21 = vpop.f32.mrb[3].mxu0 }
 0x18f   : > { %v1275_v14 = vpop.f32.mrb[2].mxu1  ;;  %v1225_v22 = vadd.f32 %v1224_v21, %v1223_v20  ;;  %v801_v23 = vadd.f32 %v1222_v19, %v1136_v18 }
 0x190   : > { %v868_v15 = vpop.f32.mrb[3].mxu1 }
 0x191   : > { %v866_v24 = vadd.f32 %v865_v13, %v801_v23  ;;  %v804_v25 = vadd.f32 %v1225_v22, %v1136_v18 }
 0x193   : > { %v869_v26 = vadd.f32 %v868_v15, %v804_v25  ;;  %v1226_v27 = vpop.f32.mrb[4].mxu0  ;;  %v896_v29 = vmax.f32 %v866_v24, 0.0 }
 0x194   : > { %v1227_v28 = vpop.f32.mrb[5].mxu0 }
 0x195   : > { %v897_v30 = vmax.f32 %v869_v26, 0.0  ;;  %v1228_v31 = vadd.f32 %v1227_v28, %v1226_v27  ;;  %v1229_v32 = vpop.f32.mrb[6].mxu0  ;;  %v1278_v37 = vpop.f32.mrb[4].mxu1 }
 0x196   : > { %v1230_v33 = vpop.f32.mrb[7].mxu0  ;;  %v881_v38 = vpop.f32.mrb[5].mxu1 }
 0x197   : > { %v1184_v34 = vpack.c.bf16 %v897_v30, %v896_v29  ;;  %v809_v35 = vadd.f32 %v1228_v31, %v1136_v18  ;;  %v1231_v36 = vadd.f32 %v1230_v33, %v1229_v32  ;;  %v1279_v41 = vpop.f32.mrb[6].mxu1 }
 0x198   : > { %v884_v42 = vpop.f32.mrb[7].mxu1 }
 0x199   : > { %1185 = vst [vmem:[%s1959_s22] sm:$0xff] %v1184_v34   ;;  %v874_v39 = vadd.f32 %v1274_v12, %v809_v35  ;;  %v812_v40 = vadd.f32 %v1231_v36, %v1136_v18 }
 0x19b   : > { %v877_v43 = vadd.f32 %v1275_v14, %v812_v40  ;;  %v1232_v44 = vpop.f32.mrb[8].mxu0  ;;  %v898_v46 = vmax.f32 %v874_v39, 0.0 }
 0x19c   : > { %v1233_v45 = vpop.f32.mrb[9].mxu0 }
 0x19d   : > { %v899_v47 = vmax.f32 %v877_v43, 0.0  ;;  %v1234_v48 = vadd.f32 %v1233_v45, %v1232_v44  ;;  %v1235_v49 = vpop.f32.mrb[10].mxu0 }
 0x19e   : > { %v1236_v50 = vpop.f32.mrb[11].mxu0 }
 0x19f   : > { %v1189_v51 = vpack.c.bf16 %v899_v47, %v898_v46  ;;  %v1237_v52 = vadd.f32 %v1236_v50, %v1235_v49  ;;  %v817_v53 = vadd.f32 %v1234_v48, %v1136_v18 }
 0x1a1   : > { %1201 = vst [vmem:[%s1959_s22 + $0x8] sm:$0xff] %v1189_v51   ;;  %v882_v54 = vadd.f32 %v881_v38, %v817_v53  ;;  %v820_v55 = vadd.f32 %v1237_v52, %v1136_v18 }
 0x1a3   : > { %v885_v56 = vadd.f32 %v884_v42, %v820_v55  ;;  %v1238_v57 = vpop.f32.mrb[12].mxu0  ;;  %v900_v59 = vmax.f32 %v882_v54, 0.0 }
 0x1a4   : > { %v1239_v58 = vpop.f32.mrb[13].mxu0 }
 0x1a5   : > { %v901_v60 = vmax.f32 %v885_v56, 0.0  ;;  %v1240_v61 = vadd.f32 %v1239_v58, %v1238_v57  ;;  %v1241_v62 = vpop.f32.mrb[14].mxu0 }
 0x1a6   : > { %v1242_v63 = vpop.f32.mrb[15].mxu0 }
 0x1a7   : > { %v1194_v0 = vpack.c.bf16 %v901_v60, %v900_v59  ;;  %v825_v1 = vadd.f32 %v1240_v61, %v1136_v18  ;;  %v1243_v2 = vadd.f32 %v1242_v63, %v1241_v62 }
 0x1a9   : > { %1202 = vst [vmem:[%s1959_s22 + $0x10] sm:$0xff] %v1194_v0   ;;  %v890_v3 = vadd.f32 %v1278_v37, %v825_v1  ;;  %v828_v4 = vadd.f32 %v1243_v2, %v1136_v18 }
 0x1ab   : > { %v893_v5 = vadd.f32 %v1279_v41, %v828_v4  ;;  %v902_v6 = vmax.f32 %v890_v3, 0.0 }
 0x1ad   : > { %v903_v7 = vmax.f32 %v893_v5, 0.0 }
 0x1af   : > { %v1199_v8 = vpack.c.bf16 %v903_v7, %v902_v6 }
 0x1b1   : > { %1203 = vst [vmem:[%s1959_s22 + $0x18] sm:$0xff] %v1199_v8  }
 0x1b2   : > { %1531 = shalt.err (!%p1528_p12)
}
 0x1b3   : > { %s1532_s12 = scalar_lea.hbm %s1971_s24, 512  ;;  %s1536_s16 = scalar_lea.hbm %s2026_s5, 1536 }
 0x1b4   : > { %p1533_p0 = scmp.ne.s32.totalorder %s1971_s24, %s1532_s12  ;;  %p1537_p11 = scmp.lt.u32.totalorder %s1971_s24, %s2026_s5 }
 0x1b5   : > { %p1538_p3 = scmp.lt.u32.totalorder %s1536_s16, %s1532_s12  ;;  %p1540_p5 = scmp.lt.u32.totalorder %s1532_s12, %s1971_s24 }
 0x1b6   : > { %p1534_p2 = pnand %p1533_p0, %p2075_p10 }
 0x1b7   : > { %p1539_p1 = por %p1538_p3, %p1537_p11 }
 0x1b8   : > { %p1535_p9 = pneg %p1534_p2 }
 0x1b9   : > { %p1541_p13 = por %p1540_p5, %p1539_p1 }
 0x1bb   : > { %p1542_p7 = pnand %p1541_p13, %p1535_p9 }
 0x1bd   : > { %1545 = shalt.err (!%p1542_p7)
}
 0x1be   : > { %s1617_s13 = smov 64   ;;  %s1618_s7 = smov 4  }
 0x1bf   : > { %1293 = dma.vmem_to_hbm [thread:$0]  (%p2075_p10), %s1966_s9, 512, %s1971_s24, %s945_s14, %s1617_s13, %s1617_s13, %s1618_s7  }
 0x1c0 PF: > { %s2076_s20 = sld [smem:[#allocation16_spill]]  ;;  %s2077_s23 = sld [smem:[#allocation22_spill]] }
 0x1c1   : > { %s2078_s17 = sld [smem:[#allocation19_spill]] }
 0x1c6   : > { %s981_s26 = sand.u32 1, %s2076_s20   ;;  %p2079_p4 = scmp.ne.s32.totalorder %s2077_s23, 0 }
 0x1c7   : > { %p2080_p6 = scmp.ge.s32.totalorder %s2078_s17, 2  ;;  %s982_s22 = scalar_lea.sflag [#allocation5], %s981_s26 }
 0x1c9   : > { %p1310_p8 = pnand %p2080_p6, %p2079_p4 }
 0x1cb   : > { %1583 = dma.done.wait (!%p1310_p8), %s982_s22, 512  }
 0x1cc   : > { %1585 = vsyncadd (!%p1310_p8), %s982_s22, 4294966784  ;;  %s25_s23 = sadd.s32 1, %s2078_s17   ;;  %s2081_s8 = sld [smem:[#allocation17_spill]] }
 0x1cd   : > { %p22_p12 = scmp.ge.s32.totalorder %s25_s23, 4   ;;  %s2082_s20 = sld [smem:[#allocation21_spill]] }
 0x1ce   : > { %s2083_s21 = sld [smem:[#allocation18_spill]]  ;;  %s2084_s22 = sld [smem:[#allocation20_spill]] }
 0x1cf   : > { %s2085_s18 = smov %s1592_s19  ;;  %24 = sbr.rel (!%p22_p12) target bundleno = 11 (0xb), region = 113 }
 0x1d2   : > { %s2086_s19 = smov %s2081_s8 }
 0x1d6   :  { %987 = vsyncpa [#allocation4], 1 }
 0x1d7   :  { %989 = vsyncpa [#allocation4 + $0x1], 1 }
 0x1d8   :  { %990 = vsyncpa [#allocation7], 1 }
 0x1d9   :  { %992 = vsyncpa [#allocation7 + $0x1], 1 }
 0x1da   :  { %993 = vsyncpa [#allocation10], 1 }
 0x1db   :  { %994 = vsyncpa [#allocation5], 1 }
 0x1dc   :  { %996 = vsyncpa [#allocation5 + $0x1], 1 }

</bundles_post_ra>
